<compile_context>
chip_gen: v7x
topology: tpu7x:2x2x1
jax: 0.10.0
libtpu: 0.0.40
codegen_flags: <defaults>
</compile_context>

<pallas_src>
import functools

import jax
import jax.numpy as jnp
from jax import lax
from jax.experimental import pallas as pl
from jax.experimental.pallas import tpu as pltpu


# ---------------------------------------------------------------------------
# Whole-array path (small / medium d): no grid, everything VMEM resident.
# ---------------------------------------------------------------------------
def _whole_loss_kernel(mu_ref, xc_ref, xr_ref, yr_ref, a_ref, q_ref, o_ref):
    xc = xc_ref[...].astype(jnp.float32)                   # (d, 1)
    xr = xr_ref[...].astype(jnp.float32)                   # (1, d)
    yr = yr_ref[...].astype(jnp.float32)                   # (1, d)
    # u = x^T A, v = x^T Q as rows (VPU broadcast-multiply + sublane reduce).
    # No MXU: a (1,d)@(d,d) GEMV uses 1 of 256 systolic rows for zero benefit.
    u = jnp.sum(a_ref[...].astype(jnp.float32) * xc, axis=0, keepdims=True)
    v = jnp.sum(q_ref[...].astype(jnp.float32) * xc, axis=0, keepdims=True)
    mu = mu_ref[0, 0]
    row = u * yr + 0.5 * (v * xr) - (0.5 * mu) * (yr * yr)
    o_ref[...] = jnp.sum(row, axis=1, keepdims=True)       # (1, 1)


def _whole_array_loss(mu, x_col, x_row, y_row, A, Q):
    vmem = lambda: pl.BlockSpec(memory_space=pltpu.MemorySpace.VMEM)
    smem = lambda: pl.BlockSpec(memory_space=pltpu.MemorySpace.SMEM)
    return pl.pallas_call(
        _whole_loss_kernel,
        out_shape=jax.ShapeDtypeStruct((1, 1), jnp.float32),
        in_specs=[smem(), vmem(), vmem(), vmem(), vmem(), vmem()],
        out_specs=vmem(),
    )(mu, x_col, x_row, y_row, A, Q)


# ---------------------------------------------------------------------------
# Tiled path (large d): stream A and Q straight from HBM with double-buffered
# (tk, tn) BlockSpec tiles; row tiles are the reduction, column tiles are
# independent ("parallel" -> both v7x TensorCores stream half the matrices).
# ---------------------------------------------------------------------------
def _tiled_loss_kernel(mu_ref, xc_ref, xr_ref, yr_ref, a_ref, q_ref, o_ref,
                       acc_a_ref, acc_q_ref, *, d, tk, tn):
    j = pl.program_id(0)            # column tile ("parallel", outermost)
    i = pl.program_id(1)            # row tile = reduction ("arbitrary", innermost)
    n_i = pl.num_programs(1)

    @pl.when(i == 0)
    def _init():
        acc_a_ref[...] = jnp.zeros_like(acc_a_ref)
        acc_q_ref[...] = jnp.zeros_like(acc_q_ref)

    xc = xc_ref[...].astype(jnp.float32)                   # (tk, 1)
    pa = a_ref[...].astype(jnp.float32) * xc                # (tk, tn)
    pq = q_ref[...].astype(jnp.float32) * xc                # (tk, tn)
    if d % tk:  # static: ragged last row block -> mask padding garbage
        rmask = (lax.broadcasted_iota(jnp.int32, (tk, 1), 0) + i * tk) < d
        pa = jnp.where(rmask, pa, 0.0)
        pq = jnp.where(rmask, pq, 0.0)
    acc_a_ref[...] += jnp.sum(pa, axis=0, keepdims=True)   # partial of x^T A
    acc_q_ref[...] += jnp.sum(pq, axis=0, keepdims=True)   # partial of x^T Q

    @pl.when(i == n_i - 1)
    def _finalize():
        mu = mu_ref[0, 0]
        yr = yr_ref[...].astype(jnp.float32)                # (1, tn)
        xr = xr_ref[...].astype(jnp.float32)                # (1, tn)
        row = (acc_a_ref[...] * yr + 0.5 * (acc_q_ref[...] * xr)
               - (0.5 * mu) * (yr * yr))
        if d % tn:  # static: ragged last column block -> mask padding lanes
            cmask = (lax.broadcasted_iota(jnp.int32, (1, tn), 1) + j * tn) < d
            row = jnp.where(cmask, row, 0.0)
        part = jnp.sum(row, axis=1, keepdims=True)          # (1, 1)
        # Lane-dense (1,128) store; lane 0 carries this column tile's partial.
        o_ref[...] = jnp.broadcast_to(part, (1, 128))


def _tiled_loss(mu, x_col, x_row, y_row, A, Q, *, tk, tn):
    d = x_col.shape[0]
    n_i = pl.cdiv(d, tk)
    n_j = pl.cdiv(d, tn)
    kernel = functools.partial(_tiled_loss_kernel, d=d, tk=tk, tn=tn)
    grid_spec = pltpu.PrefetchScalarGridSpec(
        num_scalar_prefetch=0,
        grid=(n_j, n_i),
        in_specs=[
            pl.BlockSpec((1, 1), lambda j, i: (0, 0),
                         memory_space=pltpu.MemorySpace.SMEM),   # mu scalar
            pl.BlockSpec((tk, 1), lambda j, i: (i, 0)),          # x column segment
            pl.BlockSpec((1, tn), lambda j, i: (0, j)),          # x row segment
            pl.BlockSpec((1, tn), lambda j, i: (0, j)),          # y row segment
            pl.BlockSpec((tk, tn), lambda j, i: (i, j)),         # A tile
            pl.BlockSpec((tk, tn), lambda j, i: (i, j)),         # Q tile
        ],
        out_specs=pl.BlockSpec((1, 128), lambda j, i: (0, j)),
        scratch_shapes=[pltpu.VMEM((1, tn), jnp.float32),        # acc of x^T A
                        pltpu.VMEM((1, tn), jnp.float32)],       # acc of x^T Q
    )
    partials = pl.pallas_call(
        kernel,
        out_shape=jax.ShapeDtypeStruct((1, n_j * 128), jnp.float32),
        grid_spec=grid_spec,
        compiler_params=pltpu.CompilerParams(
            dimension_semantics=("parallel", "arbitrary")),
    )(mu, x_col, x_row, y_row, A, Q)
    # Trivial n_j-element combine of the per-column-tile partials (lane 0 of
    # each 128-wide block) outside the kernel.
    return jnp.sum(partials[:, ::128], axis=1, keepdims=True)


def problem_loss(x, dual_y, A, Q, mu_y, *, tk=512, tn=512, max_whole_d=1024):
    """Pallas evaluation of x^T A y + 1/2 x^T Q x - mu_y/2 ||y||^2 -> (1, 1)."""
    d = x.shape[0]
    mu = jnp.asarray(mu_y, dtype=jnp.float32).reshape(1, 1)
    x_col = x.reshape(d, 1)          # no dtype cast: kernel upcasts per tile
    x_row = x.reshape(1, d)
    y_row = dual_y.reshape(1, d)
    if d <= max_whole_d:
        return _whole_array_loss(mu, x_col, x_row, y_row, A, Q)
    return _tiled_loss(mu, x_col, x_row, y_row, A, Q,
                       tk=min(tk, d), tn=min(tn, d))


# ---------------------------------------------------------------------------
# Deterministic problem construction + pure-JAX reference.
# ---------------------------------------------------------------------------
def build_problem_params(d: int, mu_y: float, key):
    """Re-creation of the quadratic saddle-point problem parameters (float32)."""
    k1, k2, k3, k4, k5 = jax.random.split(key, 5)

    # nn.Parameter(torch.rand(d, 1)) -> uniform [0, 1)
    x = jax.random.uniform(k1, (d, 1), dtype=jnp.float32)
    dual_y = jax.random.uniform(k2, (d, 1), dtype=jnp.float32)

    # Lambda_A = diag(U(-10, 10)); Lambda_Q = -Lambda_A**2 * mu_y + diag(U(-5, 5))
    lam_a = jax.random.uniform(k3, (d,), minval=-10.0, maxval=10.0, dtype=jnp.float32)
    lam_q_extra = jax.random.uniform(k4, (d,), minval=-5.0, maxval=5.0, dtype=jnp.float32)
    Lambda_A = jnp.diag(lam_a)
    Lambda_Q = -(Lambda_A ** 2) * mu_y + jnp.diag(lam_q_extra)

    # V, _ = qr(rand(d, d)); A = V.T @ Lambda_A @ V; Q = V.T @ Lambda_Q @ V
    foo = jax.random.uniform(k5, (d, d), dtype=jnp.float32)
    V, _ = jnp.linalg.qr(foo)
    A = V.T @ Lambda_A @ V
    Q = V.T @ Lambda_Q @ V

    return x, dual_y, A.astype(jnp.float32), Q.astype(jnp.float32)


def reference_loss(x, dual_y, A, Q, mu_y: float):
    # x.T @ A @ y + 1/2 x.T @ Q @ x - mu_y/2 * ||y||^2  -> (1, 1)
    t1 = x.T @ A @ dual_y
    t2 = 0.5 * (x.T @ Q @ x)
    t3 = (mu_y / 2.0) * (jnp.linalg.norm(dual_y) ** 2)
    return t1 + t2 - t3


if __name__ == "__main__":
    mu_y = 0.5
    key = jax.random.PRNGKey(0)

    cases = [
        # (d, dtype, wrapper kwargs)
        (32,  jnp.float32, {}),                                     # whole-array VPU path
        (256, jnp.float32, dict(max_whole_d=0, tk=128, tn=128)),    # tiled, divides evenly
        (200, jnp.float32, dict(max_whole_d=0, tk=128, tn=128)),    # tiled, ragged edge masks
        (128, jnp.bfloat16, dict(max_whole_d=0, tk=128, tn=128)),   # bf16 streamed, f32 accum
    ]
    for case_idx, (d, dtype, kwargs) in enumerate(cases):
        k = jax.random.fold_in(key, case_idx)
        x, dual_y, A, Q = build_problem_params(d, mu_y, k)
        x, dual_y, A, Q = (t.astype(dtype) for t in (x, dual_y, A, Q))

        out = jax.block_until_ready(problem_loss(x, dual_y, A, Q, mu_y, **kwargs))
        ref = reference_loss(x.astype(jnp.float32), dual_y.astype(jnp.float32),
                             A.astype(jnp.float32), Q.astype(jnp.float32), mu_y)

        assert out.shape == (1, 1), out.shape
        assert jnp.allclose(out, ref, rtol=2e-3, atol=1e-1), (d, str(dtype), out, ref)

    print("KERNEL_OK")
</pallas_src>

<mosaic_0001>
module attributes {stable_mosaic.version = 11 : i64} {
  func.func @_whole_loss_kernel(%arg0: memref<1x1xf32, #tpu.memory_space<smem>>, %arg1: memref<32x1xf32, #tpu.memory_space<vmem>>, %arg2: memref<1x32xf32, #tpu.memory_space<vmem>>, %arg3: memref<1x32xf32, #tpu.memory_space<vmem>>, %arg4: memref<32x32xf32, #tpu.memory_space<vmem>>, %arg5: memref<32x32xf32, #tpu.memory_space<vmem>>, %arg6: memref<1x1xf32, #tpu.memory_space<vmem>>) attributes {dimension_semantics = [], scalar_prefetch = 0 : i64, scratch_operands = 0 : i64, tpu.core_type = #tpu.core_type<tc>} {
    %c0 = arith.constant 0 : index
    %c0_0 = arith.constant 0 : index
    %0 = vector.load %arg1[%c0, %c0_0] : memref<32x1xf32, #tpu.memory_space<vmem>>, vector<32x1xf32>
    %c0_1 = arith.constant 0 : index
    %c0_2 = arith.constant 0 : index
    %1 = vector.load %arg2[%c0_1, %c0_2] : memref<1x32xf32, #tpu.memory_space<vmem>>, vector<1x32xf32>
    %c0_3 = arith.constant 0 : index
    %c0_4 = arith.constant 0 : index
    %2 = vector.load %arg3[%c0_3, %c0_4] : memref<1x32xf32, #tpu.memory_space<vmem>>, vector<1x32xf32>
    %c0_5 = arith.constant 0 : index
    %c0_6 = arith.constant 0 : index
    %3 = vector.load %arg4[%c0_5, %c0_6] : memref<32x32xf32, #tpu.memory_space<vmem>>, vector<32x32xf32>
    %4 = vector.broadcast %0 : vector<32x1xf32> to vector<32x32xf32>
    %5 = arith.mulf %3, %4 : vector<32x32xf32>
    %cst = arith.constant dense<0.000000e+00> : vector<32xf32>
    %6 = vector.multi_reduction <add>, %5, %cst [0] : vector<32x32xf32> to vector<32xf32>
    %7 = vector.shape_cast %6 : vector<32xf32> to vector<1x32xf32>
    %c0_7 = arith.constant 0 : index
    %c0_8 = arith.constant 0 : index
    %8 = vector.load %arg5[%c0_7, %c0_8] : memref<32x32xf32, #tpu.memory_space<vmem>>, vector<32x32xf32>
    %9 = vector.broadcast %0 : vector<32x1xf32> to vector<32x32xf32>
    %10 = arith.mulf %8, %9 : vector<32x32xf32>
    %cst_9 = arith.constant dense<0.000000e+00> : vector<32xf32>
    %11 = vector.multi_reduction <add>, %10, %cst_9 [0] : vector<32x32xf32> to vector<32xf32>
    %12 = vector.shape_cast %11 : vector<32xf32> to vector<1x32xf32>
    %c0_10 = arith.constant 0 : index
    %c0_11 = arith.constant 0 : index
    %13 = memref.load %arg0[%c0_10, %c0_11] : memref<1x1xf32, #tpu.memory_space<smem>>
    %14 = arith.mulf %7, %2 : vector<1x32xf32>
    %15 = arith.mulf %12, %1 : vector<1x32xf32>
    %cst_12 = arith.constant 5.000000e-01 : f32
    %16 = vector.broadcast %cst_12 : f32 to vector<1x32xf32>
    %17 = arith.mulf %16, %15 : vector<1x32xf32>
    %18 = arith.addf %14, %17 : vector<1x32xf32>
    %cst_13 = arith.constant 5.000000e-01 : f32
    %19 = arith.mulf %cst_13, %13 : f32
    %20 = arith.mulf %2, %2 : vector<1x32xf32>
    %21 = vector.broadcast %19 : f32 to vector<1x32xf32>
    %22 = arith.mulf %21, %20 : vector<1x32xf32>
    %23 = arith.subf %18, %22 : vector<1x32xf32>
    %cst_14 = arith.constant dense<0.000000e+00> : vector<1xf32>
    %24 = vector.multi_reduction <add>, %23, %cst_14 [1] : vector<1x32xf32> to vector<1xf32>
    %25 = vector.shape_cast %24 : vector<1xf32> to vector<1x1xf32>
    %c0_15 = arith.constant 0 : index
    %c0_16 = arith.constant 0 : index
    %26 = vector.load %arg6[%c0_15, %c0_16] : memref<1x1xf32, #tpu.memory_space<vmem>>, vector<1x1xf32>
    tpu.vector_store %arg6[%c0_15, %c0_16], %25 {strides = array<i32>} : memref<1x1xf32, #tpu.memory_space<vmem>>, vector<1x1xf32>,
    return
  }
}

</mosaic_0001>

<bundles_post_ra>
// kernel: tpu_custom_call.1
= control target key start
LH: loop header
LB: loop body
LE: loop exit
PB: predicated region body
PF: predicated region fallthrough
CT: control target
= control target key end

     0   :  { %12 = vsyncpa [#allocation4], 0  ;;  %s299_s0 = inlined_call_operand.<no memory space> [shape: f32[1,1], index: 0, kind: input, shape index: {}]   ;;  %s300_s1 = inlined_call_operand.vmem [shape: f32[32,1], index: 1, kind: input, shape index: {}]   ;;  %s301_s2 = inlined_call_operand.vmem [shape: f32[1,32], index: 2, kind: input, shape index: {}]   ;;  %s302_s3 = inlined_call_operand.vmem [shape: f32[1,32], index: 3, kind: input, shape index: {}]   ;;  %s303_s4 = inlined_call_operand.vmem [shape: f32[32,32], index: 4, kind: input, shape index: {}]   ;;  %s304_s5 = inlined_call_operand.hbm [shape: f32[32,32], index: 5, kind: input, shape index: {}]   ;;  %s305_s6 = inlined_call_operand.hbm [shape: f32[1,1], index: 6, kind: output, shape index: {}]  }
   0x1   :  { %13 = vsyncpa [#allocation5], 0  ;;  %s194_s21 = smov [#allocation3]   ;;  %s146_s25 = scalar_lea.hbm %s304_s5, 512 }
   0x2   :  { %s29_s22 = sshll.u32 %s194_s21, 4  ;;  %p147_p0 = scmp.ne.s32.totalorder %s304_s5, %s146_s25  ;;  %s30_s22 = int_to_ptr.vmem [resolvable:$true] %s29_s22 }
   0x3   :  { %p150_p1 = scmp.lt.u32.totalorder %s146_s25, %s304_s5 }
   0x5   :  { %p152_p2 = pnand %p150_p1, %p147_p0 }
   0x7   :  { %155 = shalt.err (!%p152_p2)
}
   0x8   :  { %s156_s30 = scalar_lea.vmem %s30_s22, 512  ;;  %p161_p4 = scmp.lt.s32.totalorder %s30_s22, %s30_s22 }
   0x9   :  { %p157_p3 = scmp.ne.s32.totalorder %s30_s22, %s156_s30  ;;  %p162_p5 = scmp.lt.s32.totalorder %s156_s30, %s156_s30 }
   0xb   :  { %p163_p6 = por %p162_p5, %p161_p4 }
   0xd   :  { %p164_p7 = pnand %p163_p6, %p157_p3 }
   0xf   :  { %167 = shalt.err (!%p164_p7)
}
  0x10   :  { %s195_s7 = smov 128   ;;  %s196_s8 = smov 8  }
  0x11   :  { %35 = dma.hbm_to_vmem [thread:$0]  %s304_s5, 512, %s30_s22, [#allocation4], %s195_s7, %s195_s7, %s196_s8  }
  0x12   :  { %190 = dma.done.wait [#allocation4], 512  }
  0x13   :  { %191 = vsyncadd [#allocation4], 4294966784  ;;  %v197_v0 = vmov 0   ;;  %v41_v1 = vld [vmem:[%s300_s1 + $0x10] sm:$0xff]  ;;  %v39_v2 = vld [vmem:[%s300_s1] sm:$0xff]  ;;  %vm73_vm0 = vcmask 261120  }
  0x14   :  { %145 = vset.pattern.permute.xlu1 %v197_v0  ;;  %144 = vset.pattern.permute.xlu0 %v197_v0  ;;  %v42_v3 = vld [vmem:[%s300_s1 + $0x18] sm:$0xff]  ;;  %v40_v4 = vld [vmem:[%s300_s1 + $0x8] sm:$0xff]  ;;  %v45_v5 = vld [vmem:[%s303_s4] sm:$0xff]  ;;  %s113_s26 = smul.f32 0.5, %s299_s0  ;;  %vm118_vm1 = vcmask 253952   ;;  %s198_s0 = smov [#allocation6]  }
  0x15   :  { %61 = vperm.xlu1 %145, %v41_v1   ;;  %51 = vperm.xlu0 %144, %v39_v2   ;;  %v87_v6 = vld [vmem:[#allocation3] sm:$0xff]  ;;  %v47_v9 = vld [vmem:[%s303_s4 + $0x10] sm:$0xff]  ;;  %v46_v13 = vld [vmem:[%s303_s4 + $0x8] sm:$0xff]  ;;  %s130_s7 = sshll.u32 %s198_s0, 4  ;;  %vm122_vm2 = vcmask 0   ;;  %s131_s7 = int_to_ptr.vmem [resolvable:$true] %s130_s7 }
  0x16   :  { %v89_v10 = vld [vmem:[#allocation3 + $0x10] sm:$0xff]  ;;  %v88_v14 = vld [vmem:[#allocation3 + $0x8] sm:$0xff]  ;;  %v48_v15 = vld [vmem:[%s303_s4 + $0x18] sm:$0xff]  ;;  %v115_v54 = vstv %s113_s26  ;;  %p173_p9 = scmp.lt.s32.totalorder %s131_s7, %s131_s7 }
  0x17   :  { %v90_v16 = vld [vmem:[#allocation3 + $0x18] sm:$0xff]  ;;  %v43_v49 = vld [vmem:[%s301_s2] sm:$0x1]  ;;  %s168_s2 = scalar_lea.vmem %s131_s7, 16 }
  0x18   :  { %v44_v50 = vld [vmem:[%s302_s3] sm:$0x1]  ;;  %p169_p8 = scmp.ne.s32.totalorder %s131_s7, %s168_s2  ;;  %s172_s3 = scalar_lea.vmem %s131_s7, 32 }
  0x19   :  { %66 = vperm.xlu1 %145, %v42_v3   ;;  %56 = vperm.xlu0 %144, %v40_v4   ;;  %v114_v53 = vmul.f32 %v44_v50, %v44_v50  ;;  %p174_p10 = scmp.lt.s32.totalorder %s172_s3, %s168_s2 }
  0x1b   :  { %v116_v58 = vmul.f32 %v115_v54, %v114_v53  ;;  %p175_p11 = por %p174_p10, %p173_p9 }
  0x1d   :  { %p176_p12 = pnand %p175_p11, %p169_p8 }
  0x94   :  { %v62_v7 = vpop.permute.xlu1 %61  ;;  %v52_v8 = vpop.permute.xlu0 %51 }
  0x95   :  { %v69_v11 = vmul.f32 %v52_v8, %v45_v5  ;;  %v91_v12 = vmul.f32 %v87_v6, %v52_v8  ;;  %v71_v19 = vmul.f32 %v62_v7, %v47_v9  ;;  %v93_v20 = vmul.f32 %v89_v10, %v62_v7 }
  0x97   :  { %v74_v23 = vsel %vm73_vm0, %v69_v11, 0.0  ;;  %v95_v24 = vsel %vm73_vm0, %v91_v12, 0.0  ;;  %v77_v31 = vsel %vm73_vm0, %v71_v19, 0.0  ;;  %v98_v32 = vsel %vm73_vm0, %v93_v20, 0.0 }
  0x98   :  { %v67_v17 = vpop.permute.xlu1 %66  ;;  %v57_v18 = vpop.permute.xlu0 %56 }
  0x99   :  { %v70_v21 = vmul.f32 %v57_v18, %v46_v13  ;;  %v92_v22 = vmul.f32 %v88_v14, %v57_v18  ;;  %v72_v25 = vmul.f32 %v67_v17, %v48_v15  ;;  %v94_v26 = vmul.f32 %v90_v16, %v67_v17 }
  0x9b   :  { %v75_v27 = vsel %vm73_vm0, %v70_v21, 0.0  ;;  %v96_v28 = vsel %vm73_vm0, %v92_v22, 0.0  ;;  %v79_v35 = vsel %vm73_vm0, %v72_v25, 0.0  ;;  %v100_v36 = vsel %vm73_vm0, %v94_v26, 0.0 }
  0x9c   :  { %v76_v29 = vadd.f32 %v75_v27, %v74_v23  ;;  %v97_v30 = vadd.f32 %v96_v28, %v95_v24 }
  0x9e   :  { %v78_v33 = vadd.f32 %v77_v31, %v76_v29  ;;  %v99_v34 = vadd.f32 %v98_v32, %v97_v30 }
  0xa0   :  { %v80_v37 = vadd.f32 %v79_v35, %v78_v33  ;;  %v101_v38 = vadd.f32 %v100_v36, %v99_v34 }
  0xa2   :  { %v81_v39 = vrot.slane %v80_v37, 4  ;;  %v102_v40 = vrot.slane %v101_v38, 4 }
  0xa4   :  { %v82_v41 = vadd.f32 %v81_v39, %v80_v37  ;;  %v103_v42 = vadd.f32 %v102_v40, %v101_v38 }
  0xa6   :  { %v104_v43 = vrot.slane %v103_v42, 2  ;;  %v83_v44 = vrot.slane %v82_v41, 2 }
  0xa8   :  { %v84_v45 = vadd.f32 %v83_v44, %v82_v41  ;;  %v105_v46 = vadd.f32 %v104_v43, %v103_v42 }
  0xaa   :  { %v85_v47 = vrot.slane %v84_v45, 1  ;;  %v106_v48 = vrot.slane %v105_v46, 1 }
  0xac   :  { %v86_v51 = vadd.f32 %v85_v47, %v84_v45  ;;  %v107_v52 = vadd.f32 %v106_v48, %v105_v46 }
  0xae   :  { %v110_v55 = vmul.f32 %v107_v52, %v43_v49  ;;  %v109_v56 = vmul.f32 %v86_v51, %v44_v50 }
  0xb0   :  { %v111_v57 = vmul.f32 0.5, %v110_v55 }
  0xb2   :  { %v112_v59 = vadd.f32 %v111_v57, %v109_v56 }
  0xb4   :  { %v117_v60 = vsub.f32 %v112_v59, %v116_v58 }
  0xb6   :  { %v119_v61 = vsel %vm118_vm1, %v117_v60, 0.0 }
  0xb7   :  { %120 = vadd.xlane.f32.xlu0 %v119_v61 }
 0x144   :  { %v121_v62 = vpop.xlane.xlu0 %120 }
 0x145   :  { %123 = vst.msk [vmem:[#allocation6] sm:$0x1] %vm122_vm2, %v121_v62 }
 0x146   :  { %179 = shalt.err (!%p176_p12)
}
 0x147   :  { %s180_s10 = scalar_lea.hbm %s305_s6, 16 }
 0x148   :  { %p181_p13 = scmp.ne.s32.totalorder %s305_s6, %s180_s10  ;;  %p184_p0 = scmp.lt.u32.totalorder %s180_s10, %s305_s6 }
 0x14a   :  { %p186_p1 = pnand %p184_p0, %p181_p13 }
 0x14c   :  { %189 = shalt.err (!%p186_p1)
}
 0x14d   :  { %133 = dma.vmem_to_hbm [thread:$0]  %s131_s7, 16, %s305_s6, [#allocation5]  }
 0x14e   :  { %192 = dma.done.wait [#allocation5], 16  }
 0x14f   :  { %193 = vsyncadd [#allocation5], 4294967280 }
 0x150   :  { %137 = vsyncpa [#allocation4], 1 }
 0x151   :  { %138 = vsyncpa [#allocation5], 1 }

</bundles_post_ra>
